<compile_context>
chip_gen: v7x
topology: tpu7x:2x2x1
jax: 0.10.0
libtpu: 0.0.40
codegen_flags: <defaults>
</compile_context>

<pallas_src>
import math

import numpy as np
import jax
import jax.numpy as jnp
from jax.experimental import pallas as pl
from jax.experimental.pallas import tpu as pltpu

# ---- hoisted scalar constants (plain Python floats) ----
HALF_LOG_2PI = 0.5 * math.log(2.0 * math.pi)
LOG_2 = math.log(2.0)
LOG_STD_MIN = -20.0
LOG_STD_MAX = 2.0
OUT_W = 128  # lane-dense output slab width


def round_up(n, m):
    return ((n + m - 1) // m) * m


def make_actor_kernel(obs_dim, hidden_1, hidden_2, action_dim):
    """Kernel factory; dims are closed over as static Python ints."""

    def kernel(x_ref, w1_ref, w2_ref, wh_ref, eps_ref, out_ref):
        x = x_ref[...]

        # ---- trunk: two ReLU linear layers (bias lives in the last used row) ----
        h1 = jnp.dot(x, w1_ref[0:obs_dim, :], preferred_element_type=jnp.float32)
        h1 = jnp.maximum(h1 + w1_ref[obs_dim:obs_dim + 1, :], 0.0)

        h2 = jnp.dot(h1, w2_ref[0:hidden_1, :], preferred_element_type=jnp.float32)
        h2 = jnp.maximum(h2 + w2_ref[hidden_1:hidden_1 + 1, :], 0.0)

        # ---- fused heads: one matmul for [mean | log_std] ----
        heads = jnp.dot(h2, wh_ref[0:hidden_2, :], preferred_element_type=jnp.float32)
        heads = heads + wh_ref[hidden_2:hidden_2 + 1, :]
        mean = heads[:, 0:action_dim]
        log_std = jnp.clip(heads[:, action_dim:2 * action_dim], LOG_STD_MIN, LOG_STD_MAX)
        std = jnp.exp(log_std)

        # ---- reparameterized sample: a = mean + std * eps  (dist.rsample()) ----
        eps = eps_ref[...]
        a = mean + std * eps

        # ---- Normal(mean, std).log_prob(a): (a - mean)/std == eps exactly ----
        log_prob = -0.5 * (eps * eps) - log_std - HALF_LOG_2PI

        # ---- tanh-squash correction: 2*(log 2 - a - softplus(-2a)) (stable) ----
        neg2a = -2.0 * a
        softplus = jnp.maximum(neg2a, 0.0) + jnp.log1p(jnp.exp(-jnp.abs(neg2a)))
        corr = 2.0 * (LOG_2 - a - softplus)

        # single fused row reduction
        log_pi = jnp.sum(log_prob - corr, axis=1, keepdims=True)
        tanh_a = jnp.tanh(a)

        # ---- lane-dense output slab: [tanh(a) | log_pi | zero pad] ----
        out_ref[...] = jnp.zeros_like(out_ref)
        out_ref[:, 0:action_dim] = tanh_a
        out_ref[:, action_dim:action_dim + 1] = log_pi

    return kernel


def actor_forward(x, params, eps, *, block_b=512):
    """x: (B, obs_dim) f32, eps: (B, action_dim) f32. Returns (a, log_pi)."""
    obs_dim = params["obs_dim"]
    hidden_1 = params["hidden_1"]
    hidden_2 = params["hidden_2"]
    action_dim = params["action_dim"]

    B = x.shape[0]
    tb = min(block_b, round_up(B, 8))          # batch tile (sublane-aligned)
    b_pad = round_up(B, tb)
    if b_pad != B:
        x = jnp.pad(x, ((0, b_pad - B), (0, 0)))
        eps = jnp.pad(eps, ((0, b_pad - B), (0, 0)))

    kernel = make_actor_kernel(obs_dim, hidden_1, hidden_2, action_dim)

    out = pl.pallas_call(
        kernel,
        out_shape=jax.ShapeDtypeStruct((b_pad, OUT_W), jnp.float32),
        grid_spec=pltpu.PrefetchScalarGridSpec(
            num_scalar_prefetch=0,
            grid=(b_pad // tb,),
            in_specs=[
                # batch-tiled activations
                pl.BlockSpec((tb, obs_dim), lambda i: (i, 0)),
                # parameters: constant block index -> VMEM-resident across steps
                pl.BlockSpec(params["w1b"].shape, lambda i: (0, 0)),
                pl.BlockSpec(params["w2b"].shape, lambda i: (0, 0)),
                pl.BlockSpec(params["whb"].shape, lambda i: (0, 0)),
                pl.BlockSpec((tb, action_dim), lambda i: (i, 0)),
            ],
            out_specs=pl.BlockSpec((tb, OUT_W), lambda i: (i, 0)),
        ),
        compiler_params=pltpu.CompilerParams(
            dimension_semantics=("parallel",)),   # shards batch over 2 TCs on v7x
    )(x, params["w1b"], params["w2b"], params["whb"], eps)

    a = out[:B, :action_dim]
    log_pi = out[:B, action_dim:action_dim + 1]
    return a, log_pi


def init_params(key, obs_dim, action_dim, hidden_1=128, hidden_2=128):
    """Deterministic init (uniform, PyTorch-Linear-style fan_in bound).
    Each layer is packed as (round_up(in+1, 8), out): rows [0:in] = W^T,
    row `in` = bias, remaining rows zero.  The two heads are fused along the
    output (lane) dimension: [mean_layer | log_std_layer]."""

    def linear(k, fan_in, fan_out):
        kw, kb = jax.random.split(k)
        bound = 1.0 / math.sqrt(fan_in)
        w = jax.random.uniform(kw, (fan_in, fan_out), jnp.float32, -bound, bound)
        b = jax.random.uniform(kb, (fan_out,), jnp.float32, -bound, bound)
        return w, b

    def pack(w, b):
        fan_in, fan_out = w.shape
        rows = round_up(fan_in + 1, 8)
        p = jnp.zeros((rows, fan_out), jnp.float32)
        p = p.at[:fan_in, :].set(w)
        p = p.at[fan_in, :].set(b)
        return p

    k1, k2, k3, k4 = jax.random.split(key, 4)
    w1, b1 = linear(k1, obs_dim, hidden_1)
    w2, b2 = linear(k2, hidden_1, hidden_2)
    wm, bm = linear(k3, hidden_2, action_dim)      # mean_layer
    wls, bls = linear(k4, hidden_2, action_dim)    # log_std_layer
    wh = jnp.concatenate([wm, wls], axis=1)        # fused head weight
    bh = jnp.concatenate([bm, bls], axis=0)        # fused head bias

    return dict(
        w1b=pack(w1, b1), w2b=pack(w2, b2), whb=pack(wh, bh),
        obs_dim=obs_dim, hidden_1=hidden_1, hidden_2=hidden_2,
        action_dim=action_dim,
    )


def actor_forward_ref(x, params, eps):
    """Pure-JAX reference (mirrors the PyTorch forward, stochastic + logprob)."""
    obs_dim = params["obs_dim"]
    hidden_1 = params["hidden_1"]
    hidden_2 = params["hidden_2"]
    action_dim = params["action_dim"]
    w1, b1 = params["w1b"][:obs_dim], params["w1b"][obs_dim]
    w2, b2 = params["w2b"][:hidden_1], params["w2b"][hidden_1]
    wh, bh = params["whb"][:hidden_2], params["whb"][hidden_2]

    h1 = jax.nn.relu(x @ w1 + b1)
    h2 = jax.nn.relu(h1 @ w2 + b2)
    heads = h2 @ wh + bh
    mean = heads[:, :action_dim]
    log_std = jnp.clip(heads[:, action_dim:], LOG_STD_MIN, LOG_STD_MAX)
    std = jnp.exp(log_std)
    a = mean + std * eps
    log_prob = -0.5 * ((a - mean) / std) ** 2 - log_std - HALF_LOG_2PI
    log_pi = jnp.sum(log_prob, axis=1, keepdims=True)
    corr = 2.0 * (LOG_2 - a - jax.nn.softplus(-2.0 * a))
    log_pi = log_pi - jnp.sum(corr, axis=1, keepdims=True)
    return jnp.tanh(a), log_pi


if __name__ == "__main__":
    B, obs_dim, action_dim = 64, 16, 8
    hidden_1 = hidden_2 = 128   # module defaults

    key = jax.random.PRNGKey(0)
    kp, kx, ke = jax.random.split(key, 3)

    params = init_params(kp, obs_dim, action_dim, hidden_1, hidden_2)
    x = jax.random.normal(kx, (B, obs_dim), jnp.float32)
    eps = jax.random.normal(ke, (B, action_dim), jnp.float32)   # rsample() noise

    a, log_pi = actor_forward(x, params, eps)
    jax.block_until_ready((a, log_pi))

    # sanity: shapes match the PyTorch module's (a, log_pi)
    assert a.shape == (B, action_dim) and log_pi.shape == (B, 1)

    # correctness vs. pure-JAX reference
    a_ref, lp_ref = actor_forward_ref(x, params, eps)
    assert np.allclose(np.asarray(a), np.asarray(a_ref), atol=2e-3, rtol=2e-3)
    assert np.allclose(np.asarray(log_pi), np.asarray(lp_ref), atol=2e-3, rtol=2e-3)

    print("KERNEL_OK")
</pallas_src>

<mosaic_0001>
module attributes {stable_mosaic.version = 11 : i64} {
  func.func @kernel(%arg0: i32, %arg1: memref<64x16xf32, #tpu.memory_space<vmem>>, %arg2: memref<24x128xf32, #tpu.memory_space<vmem>>, %arg3: memref<136x128xf32, #tpu.memory_space<vmem>>, %arg4: memref<136x16xf32, #tpu.memory_space<vmem>>, %arg5: memref<64x8xf32, #tpu.memory_space<vmem>>, %arg6: memref<64x128xf32, #tpu.memory_space<vmem>>) attributes {dimension_semantics = [#tpu.dimension_semantics<parallel>], iteration_bounds = array<i64: 1>, scalar_prefetch = 0 : i64, scratch_operands = 0 : i64, tpu.core_type = #tpu.core_type<tc>, window_params = [{transform_indices = @transform_0, window_bounds = array<i64: 64, 16>}, {pipeline_mode = #tpu.pipeline_mode<synchronous>, transform_indices = @transform_1, window_bounds = array<i64: 24, 128>}, {pipeline_mode = #tpu.pipeline_mode<synchronous>, transform_indices = @transform_2, window_bounds = array<i64: 136, 128>}, {pipeline_mode = #tpu.pipeline_mode<synchronous>, transform_indices = @transform_3, window_bounds = array<i64: 136, 16>}, {transform_indices = @transform_4, window_bounds = array<i64: 64, 8>}, {transform_indices = @transform_5, window_bounds = array<i64: 64, 128>}]} {
    %c0 = arith.constant 0 : index
    %c0_0 = arith.constant 0 : index
    %0 = vector.load %arg1[%c0, %c0_0] : memref<64x16xf32, #tpu.memory_space<vmem>>, vector<64x16xf32>
    %c0_1 = arith.constant 0 : index
    %c0_2 = arith.constant 0 : index
    %1 = vector.load %arg2[%c0_1, %c0_2] : memref<24x128xf32, #tpu.memory_space<vmem>>, vector<16x128xf32>
    %cst = arith.constant dense<0.000000e+00> : vector<64x128xf32>
    %2 = tpu.matmul %0, %1, %cst {dimension_numbers = #tpu.dot_dimension_numbers<[1], [0], [0], [1], [0, 0, 1, 1], [], []>} : vector<64x16xf32>, vector<16x128xf32>, vector<64x128xf32> -> vector<64x128xf32>
    %c16 = arith.constant 16 : index
    %c0_3 = arith.constant 0 : index
    %3 = vector.load %arg2[%c16, %c0_3] : memref<24x128xf32, #tpu.memory_space<vmem>>, vector<1x128xf32>
    %4 = vector.broadcast %3 : vector<1x128xf32> to vector<64x128xf32>
    %5 = arith.addf %2, %4 : vector<64x128xf32>
    %cst_4 = arith.constant 0.000000e+00 : f32
    %6 = vector.broadcast %cst_4 : f32 to vector<64x128xf32>
    %7 = arith.maximumf %5, %6 : vector<64x128xf32>
    %c0_5 = arith.constant 0 : index
    %c0_6 = arith.constant 0 : index
    %8 = vector.load %arg3[%c0_5, %c0_6] : memref<136x128xf32, #tpu.memory_space<vmem>>, vector<128x128xf32>
    %cst_7 = arith.constant dense<0.000000e+00> : vector<64x128xf32>
    %9 = tpu.matmul %7, %8, %cst_7 {dimension_numbers = #tpu.dot_dimension_numbers<[1], [0], [0], [1], [0, 0, 1, 1], [], []>} : vector<64x128xf32>, vector<128x128xf32>, vector<64x128xf32> -> vector<64x128xf32>
    %c128 = arith.constant 128 : index
    %c0_8 = arith.constant 0 : index
    %10 = vector.load %arg3[%c128, %c0_8] : memref<136x128xf32, #tpu.memory_space<vmem>>, vector<1x128xf32>
    %11 = vector.broadcast %10 : vector<1x128xf32> to vector<64x128xf32>
    %12 = arith.addf %9, %11 : vector<64x128xf32>
    %cst_9 = arith.constant 0.000000e+00 : f32
    %13 = vector.broadcast %cst_9 : f32 to vector<64x128xf32>
    %14 = arith.maximumf %12, %13 : vector<64x128xf32>
    %c0_10 = arith.constant 0 : index
    %c0_11 = arith.constant 0 : index
    %15 = vector.load %arg4[%c0_10, %c0_11] : memref<136x16xf32, #tpu.memory_space<vmem>>, vector<128x16xf32>
    %cst_12 = arith.constant dense<0.000000e+00> : vector<64x16xf32>
    %16 = tpu.matmul %14, %15, %cst_12 {dimension_numbers = #tpu.dot_dimension_numbers<[1], [0], [0], [1], [0, 0, 1, 1], [], []>} : vector<64x128xf32>, vector<128x16xf32>, vector<64x16xf32> -> vector<64x16xf32>
    %c128_13 = arith.constant 128 : index
    %c0_14 = arith.constant 0 : index
    %17 = vector.load %arg4[%c128_13, %c0_14] : memref<136x16xf32, #tpu.memory_space<vmem>>, vector<1x16xf32>
    %18 = vector.broadcast %17 : vector<1x16xf32> to vector<64x16xf32>
    %19 = arith.addf %16, %18 : vector<64x16xf32>
    %20 = vector.extract_strided_slice %19 {offsets = [0, 0], sizes = [64, 8], strides = [1, 1]} : vector<64x16xf32> to vector<64x8xf32>
    %21 = vector.extract_strided_slice %19 {offsets = [0, 8], sizes = [64, 8], strides = [1, 1]} : vector<64x16xf32> to vector<64x8xf32>
    %cst_15 = arith.constant -2.000000e+01 : f32
    %cst_16 = arith.constant 2.000000e+00 : f32
    %22 = vector.broadcast %cst_15 : f32 to vector<64x8xf32>
    %23 = arith.maximumf %22, %21 : vector<64x8xf32>
    %24 = vector.broadcast %cst_16 : f32 to vector<64x8xf32>
    %25 = arith.minimumf %24, %23 : vector<64x8xf32>
    %26 = math.exp %25 : vector<64x8xf32>
    %c0_17 = arith.constant 0 : index
    %c0_18 = arith.constant 0 : index
    %27 = vector.load %arg5[%c0_17, %c0_18] : memref<64x8xf32, #tpu.memory_space<vmem>>, vector<64x8xf32>
    %28 = arith.mulf %26, %27 : vector<64x8xf32>
    %29 = arith.addf %20, %28 : vector<64x8xf32>
    %30 = arith.mulf %27, %27 : vector<64x8xf32>
    %cst_19 = arith.constant -5.000000e-01 : f32
    %31 = vector.broadcast %cst_19 : f32 to vector<64x8xf32>
    %32 = arith.mulf %31, %30 : vector<64x8xf32>
    %33 = arith.subf %32, %25 : vector<64x8xf32>
    %cst_20 = arith.constant 0.918938517 : f32
    %34 = vector.broadcast %cst_20 : f32 to vector<64x8xf32>
    %35 = arith.subf %33, %34 : vector<64x8xf32>
    %cst_21 = arith.constant -2.000000e+00 : f32
    %36 = vector.broadcast %cst_21 : f32 to vector<64x8xf32>
    %37 = arith.mulf %36, %29 : vector<64x8xf32>
    %cst_22 = arith.constant 0.000000e+00 : f32
    %38 = vector.broadcast %cst_22 : f32 to vector<64x8xf32>
    %39 = arith.maximumf %37, %38 : vector<64x8xf32>
    %40 = math.absf %37 : vector<64x8xf32>
    %cst_23 = arith.constant 0.000000e+00 : f32
    %41 = vector.broadcast %cst_23 : f32 to vector<64x8xf32>
    %42 = arith.subf %41, %40 : vector<64x8xf32>
    %43 = math.exp %42 : vector<64x8xf32>
    %44 = math.log1p %43 : vector<64x8xf32>
    %45 = arith.addf %39, %44 : vector<64x8xf32>
    %cst_24 = arith.constant 0.693147182 : f32
    %46 = vector.broadcast %cst_24 : f32 to vector<64x8xf32>
    %47 = arith.subf %46, %29 : vector<64x8xf32>
    %48 = arith.subf %47, %45 : vector<64x8xf32>
    %cst_25 = arith.constant 2.000000e+00 : f32
    %49 = vector.broadcast %cst_25 : f32 to vector<64x8xf32>
    %50 = arith.mulf %49, %48 : vector<64x8xf32>
    %51 = arith.subf %35, %50 : vector<64x8xf32>
    %cst_26 = arith.constant dense<0.000000e+00> : vector<64xf32>
    %52 = vector.multi_reduction <add>, %51, %cst_26 [1] : vector<64x8xf32> to vector<64xf32>
    %53 = vector.shape_cast %52 : vector<64xf32> to vector<64x1xf32>
    %54 = math.tanh %29 : vector<64x8xf32>
    %cst_27 = arith.constant 0.000000e+00 : f32
    %55 = vector.broadcast %cst_27 : f32 to vector<64x128xf32>
    %c0_28 = arith.constant 0 : index
    %c0_29 = arith.constant 0 : index
    %56 = vector.load %arg6[%c0_28, %c0_29] : memref<64x128xf32, #tpu.memory_space<vmem>>, vector<64x128xf32>
    tpu.vector_store %arg6[%c0_28, %c0_29], %55 {strides = array<i32>} : memref<64x128xf32, #tpu.memory_space<vmem>>, vector<64x128xf32>,
    %c0_30 = arith.constant 0 : index
    %c0_31 = arith.constant 0 : index
    %57 = vector.load %arg6[%c0_30, %c0_31] : memref<64x128xf32, #tpu.memory_space<vmem>>, vector<64x8xf32>
    tpu.vector_store %arg6[%c0_30, %c0_31], %54 {strides = array<i32>} : memref<64x128xf32, #tpu.memory_space<vmem>>, vector<64x8xf32>,
    %c0_32 = arith.constant 0 : index
    %c8 = arith.constant 8 : index
    %58 = vector.load %arg6[%c0_32, %c8] : memref<64x128xf32, #tpu.memory_space<vmem>>, vector<64x1xf32>
    tpu.vector_store %arg6[%c0_32, %c8], %53 {strides = array<i32>} : memref<64x128xf32, #tpu.memory_space<vmem>>, vector<64x1xf32>,
    return
  }
  func.func @transform_0(%arg0: i32) -> (i32, i32) {
    %c0_i32 = arith.constant 0 : i32
    %c0_i32_0 = arith.constant 0 : i32
    return %arg0, %c0_i32 : i32, i32
  }
  func.func @transform_1(%arg0: i32) -> (i32, i32) {
    %c0_i32 = arith.constant 0 : i32
    %c0_i32_0 = arith.constant 0 : i32
    %c0_i32_1 = arith.constant 0 : i32
    return %c0_i32, %c0_i32_0 : i32, i32
  }
  func.func @transform_2(%arg0: i32) -> (i32, i32) {
    %c0_i32 = arith.constant 0 : i32
    %c0_i32_0 = arith.constant 0 : i32
    %c0_i32_1 = arith.constant 0 : i32
    return %c0_i32, %c0_i32_0 : i32, i32
  }
  func.func @transform_3(%arg0: i32) -> (i32, i32) {
    %c0_i32 = arith.constant 0 : i32
    %c0_i32_0 = arith.constant 0 : i32
    %c0_i32_1 = arith.constant 0 : i32
    return %c0_i32, %c0_i32_0 : i32, i32
  }
  func.func @transform_4(%arg0: i32) -> (i32, i32) {
    %c0_i32 = arith.constant 0 : i32
    %c0_i32_0 = arith.constant 0 : i32
    return %arg0, %c0_i32 : i32, i32
  }
  func.func @transform_5(%arg0: i32) -> (i32, i32) {
    %c0_i32 = arith.constant 0 : i32
    %c0_i32_0 = arith.constant 0 : i32
    return %arg0, %c0_i32 : i32, i32
  }
}

</mosaic_0001>

<bundles_post_ra>
// kernel: tpu_custom_call.1
= control target key start
LH: loop header
LB: loop body
LE: loop exit
PB: predicated region body
PF: predicated region fallthrough
CT: control target
= control target key end

     0   :  { %vm36_vm0 = vcmask 130048   ;;  %s1776_s0 = inlined_call_operand.vmem [shape: f32[64,16], index: 0, kind: input, shape index: {}]   ;;  %s1777_s1 = inlined_call_operand.vmem [shape: f32[24,128], index: 1, kind: input, shape index: {}]   ;;  %s1778_s2 = inlined_call_operand.vmem [shape: f32[136,128], index: 2, kind: input, shape index: {}]   ;;  %s1779_s3 = inlined_call_operand.vmem [shape: f32[136,16], index: 3, kind: input, shape index: {}]   ;;  %s1780_s4 = inlined_call_operand.vmem [shape: f32[64,8], index: 4, kind: input, shape index: {}]   ;;  %s1781_s5 = inlined_call_operand.hbm [shape: f32[64,128], index: 5, kind: output, shape index: {}]  }
   0x1   :  { %v29_v0 = vld [vmem:[%s1777_s1] sm:$0xff]  ;;  %v30_v1 = vld [vmem:[%s1777_s1 + $0x8] sm:$0xff]  ;;  %v176_v8 = vld [vmem:[%s1778_s2 + $0x10] sm:$0xff] }
   0x2   :  { %v21_v2 = vld [vmem:[%s1776_s0] sm:$0xff]  ;;  %v1033_v3 = vpack.c.bf16 %v30_v1, %v29_v0  ;;  %v175_v5 = vld [vmem:[%s1778_s2 + $0x8] sm:$0xff]  ;;  %v177_v9 = vld [vmem:[%s1778_s2 + $0x18] sm:$0xff] }
   0x3   :  { %933 = vmatprep.mubr.msk.f32.mxu0 %vm36_vm0, %v21_v2  ;;  %v174_v4 = vld [vmem:[%s1778_s2] sm:$0xff]  ;;  %v22_v6 = vld [vmem:[%s1776_s0 + $0x8] sm:$0xff]  ;;  %v23_v10 = vld [vmem:[%s1776_s0 + $0x10] sm:$0xff]  ;;  %v1041_v11 = vpack.c.bf16 %v177_v9, %v176_v8 }
   0x4   :  { %1034 = vmatprep.subr.bf16.mxu0 %v1033_v3  ;;  %v1037_v7 = vpack.c.bf16 %v175_v5, %v174_v4  ;;  %v178_v12 = vld [vmem:[%s1778_s2 + $0x20] sm:$0xff]  ;;  %v179_v13 = vld [vmem:[%s1778_s2 + $0x28] sm:$0xff]  ;;  %v24_v14 = vld [vmem:[%s1776_s0 + $0x18] sm:$0xff] }
   0x5   :  { %1036 = vmatpush3.bf16.msra.mxu0 %v1033_v3  ;;  %v1045_v15 = vpack.c.bf16 %v179_v13, %v178_v12 }
   0x6   :  { %1038 = vmatprep.subr.bf16.mxu1 %v1037_v7 }
   0x7   :  { %1040 = vmatpush3.bf16.msra.mxu1 %v1037_v7 }
   0x8   :  { %934 = vmatmul.mubr.msk.f32.vlgmr.msra.gmra.mrb[0].mxu0 %vm36_vm0, %v22_v6  ;;  %1042 = vmatprep.subr.bf16.mxu1 %v1041_v11 }
   0x9   :  { %936 = vmatprep.mubr.msk.f32.mxu0 %vm36_vm0, %v23_v10 }
   0xa   :  { %10 = vsyncpa [#allocation3], 0  ;;  %v25_v16 = vld [vmem:[%s1776_s0 + $0x20] sm:$0xff]  ;;  %v180_v17 = vld [vmem:[%s1778_s2 + $0x30] sm:$0xff]  ;;  %s1194_s30 = smov 8   ;;  %vm778_vm1 = vcmask 64512  }
   0xb   :  { %v181_v18 = vld [vmem:[%s1778_s2 + $0x38] sm:$0xff]  ;;  %1044 = vmatpush3.bf16.msra.mxu1 %v1041_v11  ;;  %v26_v19 = vld [vmem:[%s1776_s0 + $0x28] sm:$0xff]  ;;  %v27_v21 = vld [vmem:[%s1776_s0 + $0x30] sm:$0xff]  ;;  %vm827_vm10 = vcmask 72768   ;;  %s1197_s19 = smov [#allocation2]  }
   0xc   :  { %937 = vmatmul.mubr.msk.f32.gmra.mrb[2].mxu0 %vm36_vm0, %v24_v14  ;;  %1046 = vmatprep.subr.bf16.mxu1 %v1045_v15  ;;  %v1049_v20 = vpack.c.bf16 %v181_v18, %v180_v17  ;;  %v182_v22 = vld [vmem:[%s1778_s2 + $0x40] sm:$0xff]  ;;  %v183_v23 = vld [vmem:[%s1778_s2 + $0x48] sm:$0xff]  ;;  %v28_v24 = vld [vmem:[%s1776_s0 + $0x38] sm:$0xff]  ;;  %s841_s20 = sshll.u32 %s1197_s19, 4  ;;  %s842_s20 = int_to_ptr.vmem [resolvable:$true] %s841_s20 }
   0xd   :  { %939 = vmatprep.mubr.msk.f32.mxu0 %vm36_vm0, %v25_v16  ;;  %v1053_v25 = vpack.c.bf16 %v183_v23, %v182_v22  ;;  %v184_v26 = vld [vmem:[%s1778_s2 + $0x50] sm:$0xff]  ;;  %v185_v27 = vld [vmem:[%s1778_s2 + $0x58] sm:$0xff]  ;;  %v186_v29 = vld [vmem:[%s1778_s2 + $0x60] sm:$0xff]  ;;  %s1170_s21 = scalar_lea.vmem %s842_s20, 1024  ;;  %p1175_p1 = scmp.lt.s32.totalorder %s842_s20, %s842_s20 }
   0xe   :  { %v1057_v28 = vpack.c.bf16 %v185_v27, %v184_v26  ;;  %v187_v30 = vld [vmem:[%s1778_s2 + $0x68] sm:$0xff]  ;;  %v188_v32 = vld [vmem:[%s1778_s2 + $0x70] sm:$0xff]  ;;  %v189_v33 = vld [vmem:[%s1778_s2 + $0x78] sm:$0xff]  ;;  %p1171_p0 = scmp.ne.s32.totalorder %s842_s20, %s1170_s21  ;;  %p1176_p2 = scmp.lt.s32.totalorder %s1170_s21, %s1170_s21 }
   0xf   :  { %1048 = vmatpush3.bf16.msra.mxu1 %v1045_v15  ;;  %v1061_v31 = vpack.c.bf16 %v187_v30, %v186_v29  ;;  %v1065_v34 = vpack.c.bf16 %v189_v33, %v188_v32  ;;  %v308_v35 = vld [vmem:[%s1779_s3] sm:$0xff]  ;;  %v309_v36 = vld [vmem:[%s1779_s3 + $0x8] sm:$0xff]  ;;  %v310_v37 = vld [vmem:[%s1779_s3 + $0x10] sm:$0xff] }
  0x10   :  { %940 = vmatmul.mubr.msk.f32.gmra.mrb[4].mxu0 %vm36_vm0, %v26_v19  ;;  %1050 = vmatprep.subr.bf16.mxu1 %v1049_v20  ;;  %v1069_v38 = vpack.c.bf16 %v309_v36, %v308_v35  ;;  %v311_v39 = vld [vmem:[%s1779_s3 + $0x18] sm:$0xff]  ;;  %v312_v41 = vld [vmem:[%s1779_s3 + $0x20] sm:$0xff]  ;;  %v313_v42 = vld [vmem:[%s1779_s3 + $0x28] sm:$0xff]  ;;  %p1177_p3 = por %p1176_p2, %p1175_p1 }
  0x11   :  { %942 = vmatprep.mubr.msk.f32.mxu0 %vm36_vm0, %v27_v21  ;;  %v1073_v40 = vpack.c.bf16 %v311_v39, %v310_v37  ;;  %v1077_v43 = vpack.c.bf16 %v313_v42, %v312_v41  ;;  %v314_v44 = vld [vmem:[%s1779_s3 + $0x30] sm:$0xff]  ;;  %v315_v45 = vld [vmem:[%s1779_s3 + $0x38] sm:$0xff]  ;;  %v316_v47 = vld [vmem:[%s1779_s3 + $0x40] sm:$0xff] }
  0x12   :  { %1070 = vmatprep.subr.bf16.mxu0 %v1069_v38  ;;  %v1081_v46 = vpack.c.bf16 %v315_v45, %v314_v44  ;;  %v317_v48 = vld [vmem:[%s1779_s3 + $0x48] sm:$0xff]  ;;  %v318_v50 = vld [vmem:[%s1779_s3 + $0x50] sm:$0xff]  ;;  %v319_v51 = vld [vmem:[%s1779_s3 + $0x58] sm:$0xff]  ;;  %p1178_p4 = pnand %p1177_p3, %p1171_p0 }
  0x13   :  { %1052 = vmatpush3.bf16.msra.mxu1 %v1049_v20  ;;  %1072 = vmatpush3.bf16.msra.mxu0 %v1069_v38  ;;  %v1085_v49 = vpack.c.bf16 %v317_v48, %v316_v47  ;;  %v1089_v52 = vpack.c.bf16 %v319_v51, %v318_v50  ;;  %v320_v53 = vld [vmem:[%s1779_s3 + $0x60] sm:$0xff]  ;;  %v321_v54 = vld [vmem:[%s1779_s3 + $0x68] sm:$0xff]  ;;  %v852_v56 = vld [vmem:[%s1777_s1 + $0x10] ss:$0 sm:$0xff] }
  0x14   :  { %943 = vmatmul.mubr.msk.f32.gmra.mrb[6].mxu0 %vm36_vm0, %v28_v24  ;;  %1054 = vmatprep.subr.bf16.mxu1 %v1053_v25  ;;  %v1093_v55 = vpack.c.bf16 %v321_v54, %v320_v53  ;;  %v322_v17 = vld [vmem:[%s1779_s3 + $0x70] sm:$0xff]  ;;  %v323_v18 = vld [vmem:[%s1779_s3 + $0x78] sm:$0xff]  ;;  %v1369_v20 = vld [vmem:[%s1780_s4] sm:$0xff] }
  0x15   :  { %1074 = vmatprep.subr.bf16.mxu0 %v1073_v40  ;;  %v1097_v19 = vpack.c.bf16 %v323_v18, %v322_v17  ;;  %v1374_v21 = vld [vmem:[%s1780_s4 + $0x10] sm:$0xff]  ;;  %482 = vrot.lane.b32.xlu0 %v1369_v20, %s1194_s30  ;;  %v1383_v22 = vld [vmem:[%s1780_s4 + $0x8] sm:$0xff]  ;;  %v1388_v23 = vld [vmem:[%s1780_s4 + $0x18] sm:$0xff] }
  0x16   :  { %486 = vrot.lane.b32.xlu1 %v1374_v21, %s1194_s30  ;;  %v1397_v24 = vld [vmem:[%s1780_s4 + $0x28] sm:$0xff]  ;;  %v1411_v26 = vld [vmem:[%s1780_s4 + $0x38] sm:$0xff]  ;;  %v1416_v27 = vld [vmem:[%s1780_s4 + $0x30] sm:$0xff] }
  0x17   :  { %1056 = vmatpush3.bf16.msra.mxu1 %v1053_v25  ;;  %1076 = vmatpush3.bf16.msra.mxu0 %v1073_v40  ;;  %v1402_v25 = vld [vmem:[%s1780_s4 + $0x20] sm:$0xff] }
  0x18   :  { %1058 = vmatprep.subr.bf16.mxu1 %v1057_v28  ;;  %1078 = vmatprep.subr.bf16.mxu0 %v1077_v43  ;;  %v862_v53 = vld [vmem:[%s1779_s3 + $0x80] ss:$0 sm:$0xff]  ;;  %s1195_s3 = smov 120  }
  0x19   :  { %484 = vrot.lane.b32.xlu0 %v1383_v22, %s1194_s30 }
  0x1a   :  { %488 = vrot.lane.b32.xlu1 %v1388_v23, %s1194_s30 }
  0x1b   :  { %1060 = vmatpush3.bf16.msra.mxu1 %v1057_v28  ;;  %1080 = vmatpush3.bf16.msra.mxu0 %v1077_v43  ;;  %v861_v28 = vld [vmem:[%s1778_s2 + $0x80] ss:$0 sm:$0xff] }
  0x1c   :  { %1062 = vmatprep.subr.bf16.mxu1 %v1061_v31  ;;  %1082 = vmatprep.subr.bf16.mxu0 %v1081_v46 }
  0x1d   :  { %490 = vrot.lane.b32.xlu0 %v1402_v25, %s1194_s30 }
  0x1e   :  { %492 = vrot.lane.b32.xlu1 %v1397_v24, %s1194_s30 }
  0x1f   :  { %1064 = vmatpush3.bf16.msra.mxu1 %v1061_v31  ;;  %1084 = vmatpush3.bf16.msra.mxu0 %v1081_v46 }
  0x20   :  { %1066 = vmatprep.subr.bf16.mxu1 %v1065_v34  ;;  %1086 = vmatprep.subr.bf16.mxu0 %v1085_v49 }
  0x21   :  { %494 = vrot.lane.b32.xlu0 %v1416_v27, %s1194_s30 }
  0x22   :  { %496 = vrot.lane.b32.xlu1 %v1411_v26, %s1194_s30 }
  0x23   :  { %1068 = vmatpush3.bf16.msra.mxu1 %v1065_v34  ;;  %1088 = vmatpush3.bf16.msra.mxu0 %v1085_v49 }
  0x24   :  { %1090 = vmatprep.subr.bf16.mxu0 %v1089_v52 }
  0x27   :  { %1092 = vmatpush3.bf16.msra.mxu0 %v1089_v52 }
  0x28   :  { %1094 = vmatprep.subr.bf16.mxu0 %v1093_v55 }
  0x2b   :  { %1096 = vmatpush3.bf16.msra.mxu0 %v1093_v55 }
  0x2c   :  { %1098 = vmatprep.subr.bf16.mxu0 %v1097_v19 }
  0x2f   :  { %1100 = vmatpush3.bf16.msra.mxu0 %v1097_v19 }
  0xdb   :  { %v935_v57 = vpop.f32.mrb[0].mxu0 }
  0xdc   :  { %v133_v58 = vadd.f32 %v935_v57, %v852_v56  ;;  %v127_v59 = vpop.f32.mrb[1].mxu0 }
  0xdd   :  { %v128_v60 = vadd.f32 %v852_v56, %v127_v59 }
  0xde   :  { %v167_v63 = vmax.f32 %v133_v58, 0.0 }
  0xdf   :  { %v938_v61 = vpop.f32.mrb[2].mxu0  ;;  %v166_v62 = vmax.f32 %v128_v60, 0.0 }
  0xe0   :  { %v143_v0 = vadd.f32 %v938_v61, %v852_v56  ;;  %v137_v1 = vpop.f32.mrb[3].mxu0 }
  0xe1   :  { %v138_v2 = vadd.f32 %v852_v56, %v137_v1  ;;  %977 = vmatprep.mubr.f32.mxu1 %v166_v62 }
  0xe2   :  { %v169_v3 = vmax.f32 %v143_v0, 0.0  ;;  %978 = vmatmul.mubr.f32.vlgmr.msra.gmra.mrb[0].mxu1 %v167_v63 }
  0xe3   :  { %v168_v4 = vmax.f32 %v138_v2, 0.0  ;;  %v941_v5 = vpop.f32.mrb[4].mxu0 }
  0xe4   :  { %v153_v6 = vadd.f32 %v941_v5, %v852_v56  ;;  %v147_v7 = vpop.f32.mrb[5].mxu0 }
  0xe5   :  { %v148_v8 = vadd.f32 %v852_v56, %v147_v7  ;;  %980 = vmatprep.mubr.f32.mxu1 %v168_v4 }
  0xe6   :  { %v171_v9 = vmax.f32 %v153_v6, 0.0  ;;  %981 = vmatmul.mubr.f32.gmra.mrb[2].mxu1 %v169_v3 }
  0xe7   :  { %v170_v10 = vmax.f32 %v148_v8, 0.0  ;;  %v944_v11 = vpop.f32.mrb[6].mxu0 }
  0xe8   :  { %v163_v12 = vadd.f32 %v944_v11, %v852_v56  ;;  %v157_v13 = vpop.f32.mrb[7].mxu0 }
  0xe9   :  { %v158_v14 = vadd.f32 %v852_v56, %v157_v13  ;;  %983 = vmatprep.mubr.f32.mxu1 %v170_v10 }
  0xea   :  { %v173_v15 = vmax.f32 %v163_v12, 0.0  ;;  %984 = vmatmul.mubr.f32.gmra.mrb[4].mxu1 %v171_v9 }
  0xeb   :  { %v172_v16 = vmax.f32 %v158_v14, 0.0  ;;  %v483_v14 = vpop.permute.xlu0 %482 }
  0xed   :  { %986 = vmatprep.mubr.f32.mxu1 %v172_v16 }
  0xee   :  { %987 = vmatmul.mubr.f32.gmra.mrb[6].mxu1 %v173_v15  ;;  %v487_v15 = vpop.permute.xlu1 %486 }
 0x1b5   :  { %v979_v29 = vpop.f32.mrb[0].mxu1 }
 0x1b6   :  { %v267_v30 = vadd.f32 %v979_v29, %v861_v28  ;;  %v261_v31 = vpop.f32.mrb[1].mxu1 }
 0x1b7   :  { %v262_v32 = vadd.f32 %v861_v28, %v261_v31 }
 0x1b8   :  { %v301_v35 = vmax.f32 %v267_v30, 0.0 }
 0x1b9   :  { %v300_v33 = vmax.f32 %v262_v32, 0.0  ;;  %v982_v34 = vpop.f32.mrb[2].mxu1 }
 0x1ba   :  { %v277_v36 = vadd.f32 %v982_v34, %v861_v28  ;;  %v271_v37 = vpop.f32.mrb[3].mxu1 }
 0x1bb   :  { %v272_v38 = vadd.f32 %v861_v28, %v271_v37  ;;  %1021 = vmatprep.mubr.f32.mxu0 %v300_v33  ;;  %v485_v37 = vpop.permute.xlu0 %484 }
 0x1bc   :  { %1022 = vmatmul.mubr.f32.vlgmr.msra.gmra.mrb[8].mxu0 %v301_v35  ;;  %v303_v41 = vmax.f32 %v277_v36, 0.0 }
 0x1bd   :  { %v302_v39 = vmax.f32 %v272_v38, 0.0  ;;  %v985_v40 = vpop.f32.mrb[4].mxu1  ;;  %v489_v38 = vpop.permute.xlu1 %488 }
 0x1be   :  { %v287_v42 = vadd.f32 %v985_v40, %v861_v28  ;;  %v281_v43 = vpop.f32.mrb[5].mxu1 }
 0x1bf   :  { %v282_v44 = vadd.f32 %v861_v28, %v281_v43  ;;  %1024 = vmatprep.mubr.f32.mxu0 %v302_v39 }
 0x1c0   :  { %v305_v45 = vmax.f32 %v287_v42, 0.0  ;;  %1025 = vmatmul.mubr.f32.gmra.mrb[10].mxu0 %v303_v41 }
 0x1c1   :  { %v304_v46 = vmax.f32 %v282_v44, 0.0  ;;  %v988_v47 = vpop.f32.mrb[6].mxu1 }
 0x1c2   :  { %v297_v48 = vadd.f32 %v988_v47, %v861_v28  ;;  %v291_v49 = vpop.f32.mrb[7].mxu1  ;;  %v493_v47 = vpop.permute.xlu1 %492 }
 0x1c3   :  { %v292_v50 = vadd.f32 %v861_v28, %v291_v49  ;;  %1027 = vmatprep.mubr.f32.mxu0 %v304_v46 }
 0x1c4   :  { %v307_v51 = vmax.f32 %v297_v48, 0.0  ;;  %1028 = vmatmul.mubr.f32.gmra.mrb[12].mxu0 %v305_v45 }
 0x1c5   :  { %v306_v52 = vmax.f32 %v292_v50, 0.0  ;;  %v491_v50 = vpop.permute.xlu0 %490 }
 0x1c7   :  { %1030 = vmatprep.mubr.f32.mxu0 %v306_v52 }
 0x1c8   :  { %1031 = vmatmul.mubr.f32.gmra.mrb[14].mxu0 %v307_v51 }
 0x28f   :  { %v1023_v54 = vpop.f32.mrb[8].mxu0 }
 0x290   :  { %v1428_v55 = vadd.f32 %v1023_v54, %v862_v53  ;;  %v395_v56 = vpop.f32.mrb[9].mxu0 }
 0x291   :  { %v1430_v57 = vadd.f32 %v862_v53, %v395_v56 }
 0x292   :  { %v435_v58 = vmax.f32 %v1428_v55, -20.0 }
 0x293   :  { %v434_v59 = vmax.f32 %v1430_v57, -20.0  ;;  %v1026_v60 = vpop.f32.mrb[10].mxu0 }
 0x294   :  { %v1434_v61 = vmin.f32 %v435_v58, 2.0  ;;  %v1436_v62 = vadd.f32 %v1026_v60, %v862_v53  ;;  %v405_v63 = vpop.f32.mrb[11].mxu0  ;;  %v495_v60 = vpop.permute.xlu0 %494 }
 0x295   :  { %v1438_v0 = vmin.f32 %v434_v59, 2.0  ;;  %v1440_v1 = vadd.f32 %v862_v53, %v405_v63  ;;  %v497_v59 = vpop.permute.xlu1 %496 }
 0x296   :  { %v452_v2 = vmul.f32 1.442695, %v1434_v61  ;;  %v437_v3 = vmax.f32 %v1436_v62, -20.0 }
 0x297   :  { %v450_v4 = vmul.f32 1.442695, %v1438_v0  ;;  %v436_v5 = vmax.f32 %v1440_v1, -20.0  ;;  %v1029_v6 = vpop.f32.mrb[12].mxu0 }
 0x298   :  { %1106 = vpow2.f32 %v452_v2  ;;  %v1446_v7 = vmin.f32 %v437_v3, 2.0  ;;  %v1448_v8 = vadd.f32 %v1029_v6, %v862_v53  ;;  %v415_v9 = vpop.f32.mrb[13].mxu0 }
 0x299   :  { %1108 = vpow2.f32 %v450_v4  ;;  %v1450_v10 = vmin.f32 %v436_v5, 2.0  ;;  %v1452_v11 = vadd.f32 %v862_v53, %v415_v9 }
 0x29a   :  { %v456_v12 = vmul.f32 1.442695, %v1446_v7  ;;  %v439_v13 = vmax.f32 %v1448_v8, -20.0 }
 0x29b   :  { %v454_v16 = vmul.f32 1.442695, %v1450_v10  ;;  %v438_v17 = vmax.f32 %v1452_v11, -20.0  ;;  %v1032_v18 = vpop.f32.mrb[14].mxu0 }
 0x29c   :  { %1110 = vpow2.f32 %v456_v12  ;;  %v447_v19 = vmin.f32 %v439_v13, 2.0  ;;  %v1458_v28 = vadd.f32 %v1032_v18, %v862_v53  ;;  %v425_v29 = vpop.f32.mrb[15].mxu0  ;;  %v556_v18 = vmul.f32 %v1374_v21, %v1374_v21 }
 0x29d   :  { %1112 = vpow2.f32 %v454_v16  ;;  %v446_v30 = vmin.f32 %v438_v17, 2.0  ;;  %v1460_v31 = vadd.f32 %v862_v53, %v425_v29  ;;  %v1196_v53 = vmov 0.0  }
 0x29e   :  { %v460_v32 = vmul.f32 1.442695, %v447_v19  ;;  %v441_v33 = vmax.f32 %v1458_v28, -20.0  ;;  %812 = vst [vmem:[#allocation2 + $0x8] sm:$0xff] %v1196_v53  ;;  %811 = vst [vmem:[#allocation2] sm:$0xff] %v1196_v53  ;;  %v555_v29 = vmul.f32 %v1383_v22, %v1383_v22  ;;  %v557_v21 = vmul.f32 %v1388_v23, %v1388_v23 }
 0x29f   :  { %v458_v34 = vmul.f32 1.442695, %v446_v30  ;;  %v440_v35 = vmax.f32 %v1460_v31, -20.0  ;;  %813 = vst [vmem:[#allocation2 + $0x10] sm:$0xff] %v1196_v53  ;;  %814 = vst [vmem:[#allocation2 + $0x18] sm:$0xff] %v1196_v53 }
 0x2a0   :  { %1114 = vpow2.f32 %v460_v32  ;;  %v449_v36 = vmin.f32 %v441_v33, 2.0  ;;  %815 = vst [vmem:[#allocation2 + $0x20] sm:$0xff] %v1196_v53  ;;  %816 = vst [vmem:[#allocation2 + $0x28] sm:$0xff] %v1196_v53 }
 0x2a1   :  { %1116 = vpow2.f32 %v458_v34  ;;  %v448_v39 = vmin.f32 %v440_v35, 2.0  ;;  %817 = vst [vmem:[#allocation2 + $0x30] sm:$0xff] %v1196_v53  ;;  %818 = vst [vmem:[#allocation2 + $0x38] sm:$0xff] %v1196_v53 }
 0x2a2   :  { %v1107_v40 = vpop.eup %1106  ;;  %v464_v41 = vmul.f32 1.442695, %v449_v36 }
 0x2a3   :  { %v1109_v42 = vpop.eup %1108  ;;  %v462_v43 = vmul.f32 1.442695, %v448_v39  ;;  %v507_v44 = vmul.f32 %v1107_v40, %v485_v37 }
 0x2a4   :  { %1118 = vpow2.f32 %v464_v41  ;;  %v506_v45 = vmul.f32 %v1109_v42, %v483_v14 }
 0x2a5   :  { %1120 = vpow2.f32 %v462_v43  ;;  %524 = vrot.lane.b32.xlu1 %v507_v44, %s1195_s3 }
 0x2a6   :  { %v1111_v46 = vpop.eup %1110  ;;  %522 = vrot.lane.b32.xlu0 %v506_v45, %s1195_s3  ;;  %v1542_v45 = vmul.f32 -0.5, %v556_v18 }
 0x2a7   :  { %v1113_v48 = vpop.eup %1112  ;;  %v509_v49 = vmul.f32 %v1111_v46, %v489_v38 }
 0x2a8   :  { %v508_v51 = vmul.f32 %v1113_v48, %v487_v15  ;;  %v554_v15 = vmul.f32 %v1369_v20, %v1369_v20 }
 0x2a9   :  { %528 = vrot.lane.b32.xlu1 %v509_v49, %s1195_s3 }
 0x2aa   :  { %v1115_v52 = vpop.eup %1114  ;;  %526 = vrot.lane.b32.xlu0 %v508_v51, %s1195_s3  ;;  %v1538_v41 = vmul.f32 -0.5, %v554_v15  ;;  %v561_v51 = vmul.f32 %v1411_v26, %v1411_v26 }
 0x2ab   :  { %v1117_v54 = vpop.eup %1116  ;;  %v511_v56 = vmul.f32 %v1115_v52, %v493_v47 }
 0x2ac   :  { %v510_v58 = vmul.f32 %v1117_v54, %v491_v50  ;;  %v558_v50 = vmul.f32 %v1402_v25, %v1402_v25  ;;  %v560_v54 = vmul.f32 %v1416_v27, %v1416_v27 }
 0x2ad   :  { %532 = vrot.lane.b32.xlu1 %v511_v56, %s1195_s3 }
 0x2ae   :  { %v1119_v63 = vpop.eup %1118  ;;  %530 = vrot.lane.b32.xlu0 %v510_v58, %s1195_s3  ;;  %v1590_v15 = vmul.f32 -0.5, %v560_v54 }
 0x2af   :  { %v1121_v2 = vpop.eup %1120  ;;  %v513_v3 = vmul.f32 %v1119_v63, %v497_v59  ;;  %v1576_v63 = vmul.f32 -0.5, %v557_v21 }
 0x2b0   :  { %v512_v4 = vmul.f32 %v1121_v2, %v495_v60  ;;  %v1572_v60 = vmul.f32 -0.5, %v555_v29 }
 0x2b1   :  { %536 = vrot.lane.b32.xlu1 %v513_v3, %s1195_s3 }
 0x2b2   :  { %534 = vrot.lane.b32.xlu0 %v512_v4, %s1195_s3  ;;  %v1582_v4 = vmul.f32 -0.5, %v558_v50 }
 0x2b5   :  { %580 = vrot.lane.b32.xlu1 %v1434_v61, %s1195_s3 }
 0x2b6   :  { %578 = vrot.lane.b32.xlu0 %v1438_v0, %s1195_s3 }
 0x2b9   :  { %584 = vrot.lane.b32.xlu1 %v1446_v7, %s1195_s3 }
 0x2ba   :  { %582 = vrot.lane.b32.xlu0 %v1450_v10, %s1195_s3 }
 0x2bd   :  { %588 = vrot.lane.b32.xlu1 %v447_v19, %s1195_s3 }
 0x2be   :  { %586 = vrot.lane.b32.xlu0 %v446_v30, %s1195_s3 }
 0x2c1   :  { %592 = vrot.lane.b32.xlu1 %v449_v36, %s1195_s3 }
 0x2c2   :  { %590 = vrot.lane.b32.xlu0 %v448_v39, %s1195_s3 }
 0x317   :  { %v525_v5 = vpop.permute.xlu1 %524 }
 0x318   :  { %v1485_v61 = vadd.f32 %v525_v5, %v1428_v55  ;;  %v523_v6 = vpop.permute.xlu0 %522  ;;  %v1584_v5 = vmul.f32 -0.5, %v561_v51 }
 0x319   :  { %v1488_v0 = vadd.f32 %v523_v6, %v1430_v57 }
 0x31a   :  { %v1491_v7 = vmul.f32 -2.0, %v1485_v61  ;;  %1122 = vtanh.f32 %v1485_v61 }
 0x31b   :  { %v1495_v9 = vmul.f32 -2.0, %v1488_v0  ;;  %1124 = vtanh.f32 %v1488_v0  ;;  %v529_v10 = vpop.permute.xlu1 %528 }
 0x31c   :  { %v635_v12 = vand.u32 2147483647, %v1491_v7  ;;  %v1500_v55 = vadd.f32 %v529_v10, %v1436_v62  ;;  %v527_v13 = vpop.permute.xlu0 %526  ;;  %v747_v10 = vsub.f32 0.6931472, %v1485_v61  ;;  %v627_v18 = vmax.f32 %v1491_v7, 0.0 }
 0x31d   :  { %v634_v57 = vand.u32 2147483647, %v1495_v9  ;;  %v1504_v14 = vadd.f32 %v527_v13, %v1440_v1 }
 0x31e   :  { %v643_v16 = vsub.f32 0.0, %v635_v12  ;;  %v1509_v17 = vmul.f32 -2.0, %v1500_v55  ;;  %1126 = vtanh.f32 %v1500_v55  ;;  %v746_v12 = vsub.f32 0.6931472, %v1488_v0 }
 0x31f   :  { %v642_v62 = vsub.f32 0.0, %v634_v57  ;;  %v1515_v19 = vmul.f32 -2.0, %v1504_v14  ;;  %1128 = vtanh.f32 %v1504_v14  ;;  %v533_v1 = vpop.permute.xlu1 %532 }
 0x320   :  { %v652_v20 = vmul.f32 1.442695, %v643_v16  ;;  %v637_v30 = vand.u32 2147483647, %v1509_v17  ;;  %v1522_v32 = vadd.f32 %v533_v1, %v1448_v8  ;;  %v531_v33 = vpop.permute.xlu0 %530  ;;  %v559_v8 = vmul.f32 %v1397_v24, %v1397_v24 }
 0x321   :  { %v650_v34 = vmul.f32 1.442695, %v642_v62  ;;  %v636_v35 = vand.u32 2147483647, %v1515_v19  ;;  %v1528_v36 = vadd.f32 %v531_v33, %v1452_v11  ;;  %v749_v62 = vsub.f32 0.6931472, %v1500_v55 }
 0x322   :  { %1130 = vpow2.f32 %v652_v20  ;;  %v645_v37 = vsub.f32 0.0, %v637_v30  ;;  %v1531_v22 = vmul.f32 -2.0, %v1522_v32  ;;  %v1578_v2 = vmul.f32 -0.5, %v559_v8 }
 0x323   :  { %1132 = vpow2.f32 %v650_v34  ;;  %v644_v38 = vsub.f32 0.0, %v636_v35  ;;  %v1536_v39 = vmul.f32 -2.0, %v1528_v36  ;;  %v537_v23 = vpop.permute.xlu1 %536  ;;  %v626_v30 = vmax.f32 %v1495_v9, 0.0 }
 0x324   :  { %v1123_v40 = vpop.eup %1122  ;;  %v656_v11 = vmul.f32 1.442695, %v645_v37  ;;  %v639_v42 = vand.u32 2147483647, %v1531_v22  ;;  %1134 = vtanh.f32 %v1522_v32  ;;  %v535_v43 = vpop.permute.xlu0 %534  ;;  %v1548_v48 = vadd.f32 %v537_v23, %v1458_v28 }
 0x325   :  { %v1125_v44 = vpop.eup %1124  ;;  %v654_v46 = vmul.f32 1.442695, %v644_v38  ;;  %v638_v24 = vand.u32 2147483647, %v1536_v39  ;;  %1136 = vtanh.f32 %v1528_v36  ;;  %820 = vst.msk [vmem:[#allocation2 + $0x8] sm:$0xff] %vm778_vm1, %v1123_v40  ;;  %v1551_v49 = vadd.f32 %v535_v43, %v1460_v31 }
 0x326   :  { %1138 = vpow2.f32 %v656_v11  ;;  %v647_v47 = vsub.f32 0.0, %v639_v42  ;;  %819 = vst.msk [vmem:[#allocation2] sm:$0xff] %vm778_vm1, %v1125_v44  ;;  %v1561_v28 = vmul.f32 -2.0, %v1548_v48  ;;  %v748_v33 = vsub.f32 0.6931472, %v1504_v14 }
 0x327   :  { %1140 = vpow2.f32 %v654_v46  ;;  %v646_v52 = vsub.f32 0.0, %v638_v24  ;;  %v1564_v31 = vpop.permute.xlu1 %580  ;;  %v1569_v26 = vmul.f32 -2.0, %v1551_v49  ;;  %v629_v8 = vmax.f32 %v1509_v17, 0.0 }
 0x328   :  { %v1127_v53 = vpop.eup %1126  ;;  %v660_v56 = vmul.f32 1.442695, %v647_v47  ;;  %1142 = vtanh.f32 %v1548_v48  ;;  %v1566_v58 = vpop.permute.xlu0 %578  ;;  %v641_v27 = vand.u32 2147483647, %v1561_v28  ;;  %v628_v38 = vmax.f32 %v1515_v19, 0.0 }
 0x329   :  { %v1129_v25 = vpop.eup %1128  ;;  %v658_v59 = vmul.f32 1.442695, %v646_v52  ;;  %1144 = vtanh.f32 %v1551_v49  ;;  %822 = vst.msk [vmem:[#allocation2 + $0x18] sm:$0xff] %vm778_vm1, %v1127_v53  ;;  %v640_v3 = vand.u32 2147483647, %v1569_v26  ;;  %v631_v46 = vmax.f32 %v1531_v22, 0.0 }
 0x32a   :  { %1146 = vpow2.f32 %v660_v56  ;;  %821 = vst.msk [vmem:[#allocation2 + $0x10] sm:$0xff] %vm778_vm1, %v1129_v25  ;;  %v649_v13 = vsub.f32 0.0, %v641_v27  ;;  %v630_v24 = vmax.f32 %v1536_v39, 0.0  ;;  %v603_v47 = vsub.f32 %v1572_v60, %v1564_v31 }
 0x32b   :  { %1148 = vpow2.f32 %v658_v59  ;;  %v648_v1 = vsub.f32 0.0, %v640_v3  ;;  %v585_v34 = vpop.permute.xlu1 %584  ;;  %v602_v51 = vsub.f32 %v1538_v41, %v1566_v58  ;;  %v1794_v39 = vsub.f32 0.6931472, %v1528_v36 }
 0x32c   :  { %v1586_v6 = vpop.eup %1130  ;;  %v583_v57 = vpop.permute.xlu0 %582  ;;  %v664_v21 = vmul.f32 1.442695, %v649_v13  ;;  %v605_v52 = vsub.f32 %v1576_v63, %v585_v34 }
 0x32d   :  { %v1592_v16 = vpop.eup %1132  ;;  %v675_v29 = vadd.f32 1.0, %v1586_v6  ;;  %v662_v23 = vmul.f32 1.442695, %v648_v1  ;;  %v678_v43 = vmul.f32 -0.5, %v1586_v6  ;;  %v604_v53 = vsub.f32 %v1542_v45, %v583_v57 }
 0x32e   :  { %v1135_v20 = vpop.eup %1134  ;;  %v666_v35 = vadd.f32 1.0, %v1592_v16  ;;  %v669_v27 = vmul.f32 -0.5, %v1592_v16  ;;  %v681_v60 = vand.u32 2147483647, %v1586_v6  ;;  %v1632_v57 = vadd.f32 -0.9189385, %v603_v47 }
 0x32f   :  { %v1137_v37 = vpop.eup %1136  ;;  %1150 = vlog2.f32 %v675_v29  ;;  %824 = vst.msk [vmem:[#allocation2 + $0x28] sm:$0xff] %vm778_vm1, %v1135_v20  ;;  %v1627_v58 = vpop.permute.xlu1 %588  ;;  %v679_v45 = vadd.f32 1.0, %v678_v43  ;;  %v1636_v20 = vadd.f32 -0.9189385, %v602_v51  ;;  %v1640_v34 = vadd.f32 -0.9189385, %v604_v53 }
 0x330   :  { %v1603_v40 = vpop.eup %1138  ;;  %1152 = vpow2.f32 %v664_v21  ;;  %823 = vst.msk [vmem:[#allocation2 + $0x20] sm:$0xff] %vm778_vm1, %v1137_v37  ;;  %v587_v54 = vpop.permute.xlu0 %586  ;;  %v1638_v21 = vadd.f32 -0.9189385, %v605_v52  ;;  %v670_v37 = vadd.f32 1.0, %v669_v27  ;;  %vm1646_vm2 = vcmp.lt.f32.partialorder %v681_v60, 0.0004427343 }
 0x331   :  { %v1609_v44 = vpop.eup %1140  ;;  %1154 = vpow2.f32 %v662_v23  ;;  %v693_v3 = vadd.f32 1.0, %v1603_v40  ;;  %v606_v1 = vsub.f32 %v1582_v4, %v587_v54  ;;  %v696_v29 = vmul.f32 -0.5, %v1603_v40 }
 0x332   :  { %v1143_v50 = vpop.eup %1142  ;;  %1156 = vlog2.f32 %v666_v35  ;;  %v684_v63 = vadd.f32 1.0, %v1609_v44  ;;  %v672_v23 = vand.u32 2147483647, %v1592_v16  ;;  %v680_v47 = vmul.f32 %v1586_v6, %v679_v45 }
 0x333   :  { %v1145_v56 = vpop.eup %1144  ;;  %826 = vst.msk [vmem:[#allocation2 + $0x38] sm:$0xff] %vm778_vm1, %v1143_v50  ;;  %1158 = vlog2.f32 %v693_v3  ;;  %v687_v50 = vmul.f32 -0.5, %v1609_v44  ;;  %v1652_v53 = vadd.f32 -0.9189385, %v606_v1  ;;  %v697_v54 = vadd.f32 1.0, %v696_v29 }
 0x334   :  { %v1624_v31 = vpop.eup %1146  ;;  %825 = vst.msk [vmem:[#allocation2 + $0x30] sm:$0xff] %vm778_vm1, %v1145_v56  ;;  %1160 = vlog2.f32 %v684_v63  ;;  %v699_v56 = vand.u32 2147483647, %v1603_v40  ;;  %v690_v6 = vand.u32 2147483647, %v1609_v44  ;;  %v671_v63 = vmul.f32 %v1592_v16, %v670_v37 }
 0x335   :  { %v1149_v13 = vpop.eup %1148  ;;  %v711_v51 = vadd.f32 1.0, %v1624_v31  ;;  %vm1661_vm3 = vcmp.lt.f32.partialorder %v672_v23, 0.0004427343  ;;  %v714_v1 = vmul.f32 -0.5, %v1624_v31  ;;  %v688_v35 = vadd.f32 1.0, %v687_v50 }
 0x336   :  { %v702_v43 = vadd.f32 1.0, %v1149_v13  ;;  %v705_v45 = vmul.f32 -0.5, %v1149_v13  ;;  %v708_v25 = vand.u32 2147483647, %v1149_v13  ;;  %vm1672_vm4 = vcmp.lt.f32.partialorder %v699_v56, 0.0004427343 }
 0x337   :  { %v717_v23 = vand.u32 2147483647, %v1624_v31  ;;  %v698_v11 = vmul.f32 %v1603_v40, %v697_v54  ;;  %vm1678_vm5 = vcmp.lt.f32.partialorder %v690_v6, 0.0004427343  ;;  %v715_v50 = vadd.f32 1.0, %v714_v1 }
 0x338   :  { %1162 = vlog2.f32 %v702_v43  ;;  %v689_v54 = vmul.f32 %v1609_v44, %v688_v35  ;;  %vm1689_vm6 = vcmp.lt.f32.partialorder %v708_v25, 0.0004427343 }
 0x339   :  { %v1151_v52 = vpop.eup %1150  ;;  %1164 = vlog2.f32 %v711_v51  ;;  %vm1693_vm7 = vcmp.lt.f32.partialorder %v717_v23, 0.0004427343  ;;  %v716_v1 = vmul.f32 %v1624_v31, %v715_v50 }
 0x33a   :  { %v1655_v27 = vpop.eup %1152  ;;  %v677_v3 = vmul.f32 0.6931472, %v1151_v52 }
 0x33b   :  { %v1658_v60 = vpop.eup %1154  ;;  %v729_v29 = vadd.f32 1.0, %v1655_v27  ;;  %v732_v44 = vmul.f32 -0.5, %v1655_v27 }
 0x33c   :  { %v1157_v43 = vpop.eup %1156  ;;  %v683_v52 = vsel %vm1646_vm2, %v680_v47, %v677_v3  ;;  %v720_v51 = vadd.f32 1.0, %v1658_v60  ;;  %v706_v47 = vadd.f32 1.0, %v705_v45 }
 0x33d   :  { %v739_v41 = vadd.f32 %v683_v52, %v627_v18  ;;  %v668_v16 = vmul.f32 0.6931472, %v1157_v43  ;;  %v1159_v4 = vpop.eup %1158  ;;  %v591_v52 = vpop.permute.xlu0 %590 }
 0x33e   :  { %1166 = vlog2.f32 %v720_v51  ;;  %v1161_v56 = vpop.eup %1160  ;;  %v695_v40 = vmul.f32 0.6931472, %v1159_v4 }
 0x33f   :  { %v755_v7 = vsub.f32 %v747_v10, %v739_v41  ;;  %v674_v18 = vsel %vm1661_vm3, %v671_v63, %v668_v16  ;;  %1168 = vlog2.f32 %v729_v29  ;;  %v686_v43 = vmul.f32 0.6931472, %v1161_v56 }
 0x340   :  { %v738_v3 = vadd.f32 %v674_v18, %v626_v30  ;;  %v723_v10 = vmul.f32 -0.5, %v1658_v60  ;;  %v701_v9 = vsel %vm1672_vm4, %v698_v11, %v695_v40  ;;  %v707_v30 = vmul.f32 %v1149_v13, %v706_v47 }
 0x341   :  { %v763_v45 = vmul.f32 2.0, %v755_v7  ;;  %v741_v35 = vadd.f32 %v701_v9, %v629_v8  ;;  %v692_v63 = vsel %vm1678_vm5, %v689_v54, %v686_v43  ;;  %v726_v13 = vand.u32 2147483647, %v1658_v60  ;;  %v593_v54 = vpop.permute.xlu1 %592 }
 0x342   :  { %v754_v59 = vsub.f32 %v746_v12, %v738_v3  ;;  %v1163_v25 = vpop.eup %1162  ;;  %v740_v12 = vadd.f32 %v692_v63, %v628_v38  ;;  %v733_v38 = vadd.f32 1.0, %v732_v44  ;;  %v608_v47 = vsub.f32 %v1590_v15, %v591_v52 }
 0x343   :  { %v771_v41 = vsub.f32 %v1632_v57, %v763_v45  ;;  %v1165_v29 = vpop.eup %1164  ;;  %v704_v11 = vmul.f32 0.6931472, %v1163_v25  ;;  %v757_v17 = vsub.f32 %v749_v62, %v741_v35  ;;  %v724_v57 = vadd.f32 1.0, %v723_v10 }
 0x344   :  { %v762_v0 = vmul.f32 2.0, %v754_v59  ;;  %v713_v8 = vmul.f32 0.6931472, %v1165_v29  ;;  %v756_v31 = vsub.f32 %v748_v33, %v740_v12  ;;  %v735_v62 = vand.u32 2147483647, %v1655_v27 }
 0x345   :  { %v782_v51 = vsel %vm778_vm1, %v771_v41, 0.0  ;;  %v710_v19 = vsel %vm1689_vm6, %v707_v30, %v704_v11  ;;  %v765_v16 = vmul.f32 2.0, %v757_v17  ;;  %v725_v50 = vmul.f32 %v1658_v60, %v724_v57 }
 0x346   :  { %783 = vadd.xlane.f32.xlu1 %v782_v51  ;;  %v770_v42 = vsub.f32 %v1636_v20, %v762_v0  ;;  %v742_v37 = vadd.f32 %v710_v19, %v630_v24  ;;  %v719_v55 = vsel %vm1693_vm7, %v716_v1, %v713_v8  ;;  %v764_v14 = vmul.f32 2.0, %v756_v31 }
 0x347   :  { %v743_v33 = vadd.f32 %v719_v55, %v631_v46  ;;  %v773_v7 = vsub.f32 %v1638_v21, %v765_v16  ;;  %v1795_v56 = vsub.f32 0.6931472, %v1522_v32  ;;  %vm727_vm8 = vcmp.lt.f32.partialorder %v726_v13, 0.0004427343 }
 0x348   :  { %v1167_v23 = vpop.eup %1166  ;;  %v779_v20 = vsel %vm778_vm1, %v770_v42, 0.0  ;;  %v758_v24 = vsub.f32 %v1794_v39, %v742_v37  ;;  %v734_v40 = vmul.f32 %v1655_v27, %v733_v38  ;;  %vm736_vm9 = vcmp.lt.f32.partialorder %v735_v62, 0.0004427343 }
 0x349   :  { %v1169_v4 = vpop.eup %1168  ;;  %780 = vadd.xlane.f32.xlu0 %v779_v20  ;;  %v722_v18 = vmul.f32 0.6931472, %v1167_v23  ;;  %v759_v3 = vsub.f32 %v1795_v56, %v743_v33  ;;  %v788_v22 = vsel %vm778_vm1, %v773_v7, 0.0  ;;  %v772_v21 = vsub.f32 %v1640_v34, %v764_v14 }
 0x34a   :  { %v731_v15 = vmul.f32 0.6931472, %v1169_v4  ;;  %v766_v46 = vmul.f32 2.0, %v758_v24  ;;  %v1796_v45 = vmax.f32 %v1569_v26, 0.0  ;;  %v753_v32 = vsub.f32 0.6931472, %v1548_v48 }
 0x34b   :  { %v728_v6 = vsel %vm727_vm8, %v725_v50, %v722_v18  ;;  %v767_v36 = vmul.f32 2.0, %v759_v3  ;;  %v1797_v27 = vmax.f32 %v1561_v28, 0.0  ;;  %v1798_v59 = vsub.f32 %v1578_v2, %v1627_v58 }
 0x34c   :  { %v744_v43 = vadd.f32 %v728_v6, %v1796_v45  ;;  %v737_v60 = vsel %vm736_vm9, %v734_v40, %v731_v15  ;;  %v774_v61 = vsub.f32 %v1652_v53, %v766_v46  ;;  %v609_v30 = vsub.f32 %v1584_v5, %v593_v54 }
 0x34d   :  { %789 = vadd.xlane.f32.xlu0 %v788_v22  ;;  %v745_v10 = vadd.f32 %v737_v60, %v1797_v27  ;;  %v868_v9 = vadd.f32 -0.9189385, %v1798_v59  ;;  %v1799_v34 = vsub.f32 0.6931472, %v1551_v49  ;;  %v869_v41 = vadd.f32 -0.9189385, %v608_v47 }
 0x34e   :  { %v791_v26 = vsel %vm778_vm1, %v774_v61, 0.0  ;;  %v785_v48 = vsel %vm778_vm1, %v772_v21, 0.0  ;;  %v870_v63 = vadd.f32 -0.9189385, %v609_v30 }
 0x34f   :  { %v760_v44 = vsub.f32 %v1799_v34, %v744_v43  ;;  %v761_v25 = vsub.f32 %v753_v32, %v745_v10  ;;  %792 = vadd.xlane.f32.xlu1 %v791_v26  ;;  %v775_v53 = vsub.f32 %v868_v9, %v767_v36 }
 0x351   :  { %v768_v35 = vmul.f32 2.0, %v760_v44  ;;  %786 = vadd.xlane.f32.xlu0 %v785_v48  ;;  %v769_v28 = vmul.f32 2.0, %v761_v25  ;;  %v794_v2 = vsel %vm778_vm1, %v775_v53, 0.0 }
 0x353   :  { %v776_v1 = vsub.f32 %v869_v41, %v768_v35  ;;  %v777_v58 = vsub.f32 %v870_v63, %v769_v28 }
 0x355   :  { %v797_v5 = vsel %vm778_vm1, %v776_v1, 0.0  ;;  %795 = vadd.xlane.f32.xlu0 %v794_v2  ;;  %v800_v49 = vsel %vm778_vm1, %v777_v58, 0.0 }
 0x356   :  { %798 = vadd.xlane.f32.xlu1 %v797_v5 }
 0x359   :  { %801 = vadd.xlane.f32.xlu0 %v800_v49 }
 0x3d3   :  { %v784_v29 = vpop.xlane.xlu1 %783 }
 0x3d4   :  { %829 = vst.msk [vmem:[#allocation2 + $0x8] sm:$0xff] %vm827_vm10, %v784_v29 }
 0x3d6   :  { %v781_v0 = vpop.xlane.xlu0 %780 }
 0x3d7   :  { %828 = vst.msk [vmem:[#allocation2] sm:$0xff] %vm827_vm10, %v781_v0 }
 0x3da   :  { %v790_v12 = vpop.xlane.xlu0 %789 }
 0x3db   :  { %831 = vst.msk [vmem:[#allocation2 + $0x18] sm:$0xff] %vm827_vm10, %v790_v12 }
 0x3dc   :  { %v793_v11 = vpop.xlane.xlu1 %792 }
 0x3dd   :  { %832 = vst.msk [vmem:[#allocation2 + $0x20] sm:$0xff] %vm827_vm10, %v793_v11 }
 0x3de   :  { %v787_v13 = vpop.xlane.xlu0 %786 }
 0x3df   :  { %830 = vst.msk [vmem:[#allocation2 + $0x10] sm:$0xff] %vm827_vm10, %v787_v13 }
 0x3e2   :  { %v796_v51 = vpop.xlane.xlu0 %795 }
 0x3e3   :  { %v799_v52 = vpop.xlane.xlu1 %798  ;;  %833 = vst.msk [vmem:[#allocation2 + $0x28] sm:$0xff] %vm827_vm10, %v796_v51 }
 0x3e4   :  { %834 = vst.msk [vmem:[#allocation2 + $0x30] sm:$0xff] %vm827_vm10, %v799_v52 }
 0x3e6   :  { %v802_v17 = vpop.xlane.xlu0 %801 }
 0x3e7   :  { %835 = vst.msk [vmem:[#allocation2 + $0x38] sm:$0xff] %vm827_vm10, %v802_v17 }
 0x3e8   :  { %1181 = shalt.err (!%p1178_p4)
}
 0x3e9   :  { %s1182_s23 = scalar_lea.hbm %s1781_s5, 1024 }
 0x3ea   :  { %p1183_p5 = scmp.ne.s32.totalorder %s1781_s5, %s1182_s23  ;;  %p1186_p6 = scmp.lt.u32.totalorder %s1182_s23, %s1781_s5 }
 0x3ec   :  { %p1188_p7 = pnand %p1186_p6, %p1183_p5 }
 0x3ee   :  { %1191 = shalt.err (!%p1188_p7)
}
 0x3ef   :  { %s1198_s28 = smov 128  }
 0x3f0   :  { %847 = dma.vmem_to_hbm [thread:$0]  %s842_s20, 1024, %s1781_s5, [#allocation3], %s1198_s28, %s1198_s28, %s1194_s30  }
 0x3f1   :  { %1192 = dma.done.wait [#allocation3], 1024  }
 0x3f2   :  { %1193 = vsyncadd [#allocation3], 4294966272 }
 0x3f3   :  { %851 = vsyncpa [#allocation3], 1 }

</bundles_post_ra>
